<compile_context>
chip_gen: v6e
topology: v6e:2x2x1
jax: 0.10.0
libtpu: 0.0.40
codegen_flags: <defaults>
</compile_context>

<pallas_src>
import functools

import jax
import jax.numpy as jnp
from jax.experimental import pallas as pl
from jax.experimental.pallas import tpu as pltpu


# ------------------------------ fused kernel -------------------------------


def _fused_kernel(x_ref, a1_ref, c1_ref, w1_ref, b1_ref, w2_ref, b2_ref,
                  w3_ref, b3_ref, wfc2_ref, bfc2_ref, out_ref, *, tb, s_out):
    f32 = jnp.float32
    bf16 = jnp.bfloat16

    # fc1 + ReLU (in_features == 1 -> lane-broadcast scale + bias, pure VPU, f32).
    h = jnp.maximum(x_ref[...] * a1_ref[...] + c1_ref[...], 0.0)        # (R, 125)

    # conv1 + ReLU as one block matmul (weight is block-diagonal over windows).
    # bf16 MXU operands, f32 accumulation; bias/ReLU epilogue in f32 on the VPU.
    h = jnp.dot(h.astype(bf16), w1_ref[...], preferred_element_type=f32)
    h = jnp.maximum(h + b1_ref[...], 0.0)                                # (R, 200)

    # conv2 + ReLU.
    h = jnp.dot(h.astype(bf16), w2_ref[...], preferred_element_type=f32)
    h = jnp.maximum(h + b2_ref[...], 0.0)                                # (R, 80)

    # conv3 + ReLU.
    h = jnp.dot(h.astype(bf16), w3_ref[...], preferred_element_type=f32)
    c3 = jnp.maximum(h + b3_ref[...], 0.0)                               # (R, 32)

    # fc2: rows are s-major (r = s*tb + b), so position s is the contiguous
    # sublane slab c3[s*tb:(s+1)*tb].  out[b, p] = fc2_b[p]
    #   + sum_s ( c3[s*tb:(s+1)*tb, :] @ Wr[s] )[b, p]
    # -> S dense (tb,32)@(32,S) MXU dots, no per-row dots, no concatenate,
    #    no lane-dim-changing reshape.  (Wr holds torch's channel-major perm.)
    acc = jnp.zeros((tb, s_out), f32)
    for s in range(s_out):                       # S is tiny (static unroll)
        acc = acc + jnp.dot(c3[s * tb:(s + 1) * tb, :], wfc2_ref[s],
                            preferred_element_type=f32)
    out_ref[...] = acc + bfc2_ref[...]


# ------------------------- parameters & preparation ------------------------


def init_params(key, S):
    """Parameter init matching the module's shapes (fc2 zero-init as in torch)."""
    ks = jax.random.split(key, 8)

    def u(k, shape, fan_in):
        bound = fan_in ** -0.5
        return jax.random.uniform(k, shape, jnp.float32, -bound, bound)

    return dict(
        fc1_w=u(ks[0], (125 * S, 1), 1.0),          # Linear(1, 125*S)
        fc1_b=u(ks[1], (125 * S,), 1.0),
        conv1_w=u(ks[2], (8, 1, 5), 5.0),           # Conv1d(1, 8, 5, 5)
        conv1_b=u(ks[3], (8,), 5.0),
        conv2_w=u(ks[4], (16, 8, 5), 40.0),         # Conv1d(8, 16, 5, 5)
        conv2_b=u(ks[5], (16,), 40.0),
        conv3_w=u(ks[6], (32, 16, 5), 80.0),        # Conv1d(16, 32, 5, 5)
        conv3_b=u(ks[7], (32,), 80.0),
        fc2_w=jnp.zeros((S, 32 * S), jnp.float32),  # Linear(32*S, S), zeroed
        fc2_b=jnp.zeros((S,), jnp.float32),
    )


def _pick_batch_tile(B, S, max_rows=2048):
    """Batch-tile choice: keep R = tb*S <= max_rows (VMEM-safe on v5e/v6e/v7x),
    prefer >= 2 grid steps with a sublane-aligned tile (multiple of 8 batch rows)
    so the "parallel" grid axis can shard across v7x's two TensorCores."""
    cap = max(1, max_rows // S)
    for tb in range(min(B // 2, cap), 0, -1):
        if B % tb == 0 and tb % 8 == 0:
            return tb
    for tb in range(min(B, cap), 0, -1):          # fallback: single/few steps
        if B % tb == 0:
            return tb
    return B


def prepare_params(params, S, B):
    """One-time re-layout of parameters into kernel-ready matrices."""
    f32, bf16 = jnp.float32, jnp.bfloat16
    tb = _pick_batch_tile(B, S)

    # fc1: per final-position slab of 125 weights/biases, repeated over the tb
    # batch rows of ONE grid step (rows are s-major: r = s*tb + b).  These are
    # grid-invariant -> DMA'd once per call (no batch replication streamed).
    w1r = params["fc1_w"].reshape(S, 125).astype(f32)
    b1r = params["fc1_b"].reshape(S, 125).astype(f32)
    a1 = jnp.repeat(w1r, tb, axis=0)               # (tb*S, 125), row s*tb+b -> s
    c1 = jnp.repeat(b1r, tb, axis=0)

    # conv1 as block-diagonal matmul weight: W1[5u+k, 8u+o] = conv1_w[o, 0, k].
    km1 = params["conv1_w"][:, 0, :].T.astype(f32)                     # (5, 8)
    w1big = (jnp.eye(25, dtype=f32)[:, None, :, None]
             * km1[None, :, None, :]).reshape(125, 200).astype(bf16)
    b1big = jnp.tile(params["conv1_b"].astype(f32), 25)[None, :]       # (1, 200)

    # conv2: W2[(5u+k)*8 + o1, 16u + o2] = conv2_w[o2, o1, k].
    km2 = params["conv2_w"].transpose(2, 1, 0).astype(f32)             # (5, 8, 16)
    w2big = (jnp.eye(5, dtype=f32)[:, None, None, :, None]
             * km2[None, :, :, None, :]).reshape(200, 80).astype(bf16)
    b2big = jnp.tile(params["conv2_b"].astype(f32), 5)[None, :]        # (1, 80)

    # conv3: W3[k*16 + o2, o3] = conv3_w[o3, o2, k].
    w3big = params["conv3_w"].transpose(2, 1, 0).reshape(80, 32).astype(bf16)
    b3big = params["conv3_b"].astype(f32)[None, :]                     # (1, 32)

    # fc2 with torch's channel-major flatten folded in:
    # Wr[s, o, p] = fc2_w[p, o*S + s].
    wfc2r = params["fc2_w"].reshape(S, 32, S).transpose(2, 1, 0).astype(f32)
    bfc2 = params["fc2_b"].astype(f32)[None, :]                        # (1, S)

    return dict(tb=tb, a1=a1, c1=c1, w1big=w1big, b1big=b1big, w2big=w2big,
                b2big=b2big, w3big=w3big, b3big=b3big, wfc2r=wfc2r, bfc2=bfc2)


# --------------------------------- forward ----------------------------------


def forward(prep, x, *, B, S):
    tb = prep["tb"]
    assert B % tb == 0
    nb = B // tb
    R = tb * S                                      # rows per grid step

    # Only per-forward glue op: per grid step the kernel needs x[i*tb + b] at row
    # s*tb + b (s-major).  Total streamed input is just B*S*4 bytes.
    xe = jnp.tile(x.astype(jnp.float32).reshape(nb, 1, tb),
                  (1, S, 1)).reshape(nb * R, 1)

    kernel = functools.partial(_fused_kernel, tb=tb, s_out=S)

    def const2(shape):                              # grid-invariant 2-D operand
        return pl.BlockSpec(shape, lambda i: (0, 0))

    return pl.pallas_call(
        kernel,
        out_shape=jax.ShapeDtypeStruct((B, S), jnp.float32),
        grid=(nb,),
        in_specs=[
            pl.BlockSpec((R, 1), lambda i: (i, 0)),        # xe (streamed, tiny)
            const2((R, 125)),                              # a1  (fc1 w, invariant)
            const2((R, 125)),                              # c1  (fc1 b, invariant)
            const2((125, 200)),                            # w1big (bf16)
            const2((1, 200)),                              # b1big
            const2((200, 80)),                             # w2big (bf16)
            const2((1, 80)),                               # b2big
            const2((80, 32)),                              # w3big (bf16)
            const2((1, 32)),                               # b3big
            pl.BlockSpec((S, 32, S), lambda i: (0, 0, 0)),  # wfc2r
            const2((1, S)),                                # bfc2
        ],
        out_specs=pl.BlockSpec((tb, S), lambda i: (i, 0)),
        compiler_params=pltpu.CompilerParams(
            dimension_semantics=("parallel",),
            vmem_limit_bytes=32 * 1024 * 1024),
    )(xe, prep["a1"], prep["c1"], prep["w1big"], prep["b1big"],
      prep["w2big"], prep["b2big"], prep["w3big"], prep["b3big"],
      prep["wfc2r"], prep["bfc2"])


# --------------------------- pure-JAX reference -----------------------------


def reference(params, x, S, conv_dtype=jnp.float32):
    h = x @ params["fc1_w"].T + params["fc1_b"][None, :]
    h = jnp.maximum(h, 0.0)[:, None, :]                         # (B, 1, 125S)

    def conv(h, w, b):
        y = jax.lax.conv_general_dilated(
            h.astype(conv_dtype), w.astype(conv_dtype),
            window_strides=(5,), padding="VALID",
            dimension_numbers=("NCH", "OIH", "NCH"),
            preferred_element_type=jnp.float32)
        return jnp.maximum(y + b[None, :, None], 0.0)

    h = conv(h, params["conv1_w"], params["conv1_b"])
    h = conv(h, params["conv2_w"], params["conv2_b"])
    h = conv(h, params["conv3_w"], params["conv3_b"])           # (B, 32, S)

    flat = h.reshape(h.shape[0], -1)                            # torch order o*S + s
    return flat @ params["fc2_w"].T + params["fc2_b"][None, :]


# ----------------------------------- main ------------------------------------


if __name__ == "__main__":
    S = 8          # output_size
    B = 16         # small batch; yields 2 grid steps (both v7x TensorCores busy)

    key = jax.random.PRNGKey(0)
    kx, kp, kw, kb = jax.random.split(key, 4)
    x = jax.random.normal(kx, (B, 1), jnp.float32)          # Linear(1, ...) input
    params = init_params(kp, S)

    # The module zero-initializes fc2, which would make the output trivially zero
    # and leave the fc2 channel-major permutation unexercised -- use a non-zero
    # fc2 for the numerical check; forward semantics are unchanged.
    params["fc2_w"] = 0.1 * jax.random.normal(kw, (S, 32 * S), jnp.float32)
    params["fc2_b"] = 0.1 * jax.random.normal(kb, (S,), jnp.float32)

    prep = prepare_params(params, S, B)
    out = jax.block_until_ready(forward(prep, x, B=B, S=S))
    assert out.shape == (B, S)

    # Precision-matched check: reference uses the same bf16 conv-matmul operands.
    ref_m = reference(params, x, S, conv_dtype=jnp.bfloat16)
    assert jnp.allclose(out, ref_m, atol=2e-3, rtol=2e-3), (
        float(jnp.max(jnp.abs(out - ref_m))))

    # Full-f32 reference at bf16-appropriate tolerance.
    ref = reference(params, x, S)
    assert jnp.allclose(out, ref, atol=3e-2, rtol=3e-2), (
        float(jnp.max(jnp.abs(out - ref))))

    print("KERNEL_OK")
</pallas_src>

<mosaic_0001>
module attributes {stable_mosaic.version = 11 : i64} {
  func.func @_fused_kernel(%arg0: i32, %arg1: memref<64x1xf32, #tpu.memory_space<vmem>>, %arg2: memref<64x125xf32, #tpu.memory_space<vmem>>, %arg3: memref<64x125xf32, #tpu.memory_space<vmem>>, %arg4: memref<125x200xbf16, #tpu.memory_space<vmem>>, %arg5: memref<1x200xf32, #tpu.memory_space<vmem>>, %arg6: memref<200x80xbf16, #tpu.memory_space<vmem>>, %arg7: memref<1x80xf32, #tpu.memory_space<vmem>>, %arg8: memref<80x32xbf16, #tpu.memory_space<vmem>>, %arg9: memref<1x32xf32, #tpu.memory_space<vmem>>, %arg10: memref<8x32x8xf32, #tpu.memory_space<vmem>>, %arg11: memref<1x8xf32, #tpu.memory_space<vmem>>, %arg12: memref<8x8xf32, #tpu.memory_space<vmem>>) attributes {dimension_semantics = [#tpu.dimension_semantics<parallel>], iteration_bounds = array<i64: 2>, scalar_prefetch = 0 : i64, scratch_operands = 0 : i64, tpu.core_type = #tpu.core_type<tc>, window_params = [{transform_indices = @transform_0, window_bounds = array<i64: 64, 1>}, {pipeline_mode = #tpu.pipeline_mode<synchronous>, transform_indices = @transform_1, window_bounds = array<i64: 64, 125>}, {pipeline_mode = #tpu.pipeline_mode<synchronous>, transform_indices = @transform_2, window_bounds = array<i64: 64, 125>}, {pipeline_mode = #tpu.pipeline_mode<synchronous>, transform_indices = @transform_3, window_bounds = array<i64: 125, 200>}, {pipeline_mode = #tpu.pipeline_mode<synchronous>, transform_indices = @transform_4, window_bounds = array<i64: 1, 200>}, {pipeline_mode = #tpu.pipeline_mode<synchronous>, transform_indices = @transform_5, window_bounds = array<i64: 200, 80>}, {pipeline_mode = #tpu.pipeline_mode<synchronous>, transform_indices = @transform_6, window_bounds = array<i64: 1, 80>}, {pipeline_mode = #tpu.pipeline_mode<synchronous>, transform_indices = @transform_7, window_bounds = array<i64: 80, 32>}, {pipeline_mode = #tpu.pipeline_mode<synchronous>, transform_indices = @transform_8, window_bounds = array<i64: 1, 32>}, {pipeline_mode = #tpu.pipeline_mode<synchronous>, transform_indices = @transform_9, window_bounds = array<i64: 8, 32, 8>}, {pipeline_mode = #tpu.pipeline_mode<synchronous>, transform_indices = @transform_10, window_bounds = array<i64: 1, 8>}, {transform_indices = @transform_11, window_bounds = array<i64: 8, 8>}]} {
    %c0 = arith.constant 0 : index
    %c0_0 = arith.constant 0 : index
    %0 = vector.load %arg1[%c0, %c0_0] : memref<64x1xf32, #tpu.memory_space<vmem>>, vector<64x1xf32>
    %c0_1 = arith.constant 0 : index
    %c0_2 = arith.constant 0 : index
    %1 = vector.load %arg2[%c0_1, %c0_2] : memref<64x125xf32, #tpu.memory_space<vmem>>, vector<64x125xf32>
    %2 = vector.broadcast %0 : vector<64x1xf32> to vector<64x125xf32>
    %3 = arith.mulf %2, %1 : vector<64x125xf32>
    %c0_3 = arith.constant 0 : index
    %c0_4 = arith.constant 0 : index
    %4 = vector.load %arg3[%c0_3, %c0_4] : memref<64x125xf32, #tpu.memory_space<vmem>>, vector<64x125xf32>
    %5 = arith.addf %3, %4 : vector<64x125xf32>
    %cst = arith.constant 0.000000e+00 : f32
    %6 = vector.broadcast %cst : f32 to vector<64x125xf32>
    %7 = arith.maximumf %5, %6 : vector<64x125xf32>
    %8 = arith.truncf %7 : vector<64x125xf32> to vector<64x125xbf16>
    %c0_5 = arith.constant 0 : index
    %c0_6 = arith.constant 0 : index
    %9 = vector.load %arg4[%c0_5, %c0_6] : memref<125x200xbf16, #tpu.memory_space<vmem>>, vector<125x200xbf16>
    %cst_7 = arith.constant dense<0.000000e+00> : vector<64x200xf32>
    %10 = tpu.matmul %8, %9, %cst_7 {dimension_numbers = #tpu.dot_dimension_numbers<[1], [0], [0], [1], [0, 0, 1, 1], [], []>} : vector<64x125xbf16>, vector<125x200xbf16>, vector<64x200xf32> -> vector<64x200xf32>
    %c0_8 = arith.constant 0 : index
    %c0_9 = arith.constant 0 : index
    %11 = vector.load %arg5[%c0_8, %c0_9] : memref<1x200xf32, #tpu.memory_space<vmem>>, vector<1x200xf32>
    %12 = vector.broadcast %11 : vector<1x200xf32> to vector<64x200xf32>
    %13 = arith.addf %10, %12 : vector<64x200xf32>
    %cst_10 = arith.constant 0.000000e+00 : f32
    %14 = vector.broadcast %cst_10 : f32 to vector<64x200xf32>
    %15 = arith.maximumf %13, %14 : vector<64x200xf32>
    %16 = arith.truncf %15 : vector<64x200xf32> to vector<64x200xbf16>
    %c0_11 = arith.constant 0 : index
    %c0_12 = arith.constant 0 : index
    %17 = vector.load %arg6[%c0_11, %c0_12] : memref<200x80xbf16, #tpu.memory_space<vmem>>, vector<200x80xbf16>
    %cst_13 = arith.constant dense<0.000000e+00> : vector<64x80xf32>
    %18 = tpu.matmul %16, %17, %cst_13 {dimension_numbers = #tpu.dot_dimension_numbers<[1], [0], [0], [1], [0, 0, 1, 1], [], []>} : vector<64x200xbf16>, vector<200x80xbf16>, vector<64x80xf32> -> vector<64x80xf32>
    %c0_14 = arith.constant 0 : index
    %c0_15 = arith.constant 0 : index
    %19 = vector.load %arg7[%c0_14, %c0_15] : memref<1x80xf32, #tpu.memory_space<vmem>>, vector<1x80xf32>
    %20 = vector.broadcast %19 : vector<1x80xf32> to vector<64x80xf32>
    %21 = arith.addf %18, %20 : vector<64x80xf32>
    %cst_16 = arith.constant 0.000000e+00 : f32
    %22 = vector.broadcast %cst_16 : f32 to vector<64x80xf32>
    %23 = arith.maximumf %21, %22 : vector<64x80xf32>
    %24 = arith.truncf %23 : vector<64x80xf32> to vector<64x80xbf16>
    %c0_17 = arith.constant 0 : index
    %c0_18 = arith.constant 0 : index
    %25 = vector.load %arg8[%c0_17, %c0_18] : memref<80x32xbf16, #tpu.memory_space<vmem>>, vector<80x32xbf16>
    %cst_19 = arith.constant dense<0.000000e+00> : vector<64x32xf32>
    %26 = tpu.matmul %24, %25, %cst_19 {dimension_numbers = #tpu.dot_dimension_numbers<[1], [0], [0], [1], [0, 0, 1, 1], [], []>} : vector<64x80xbf16>, vector<80x32xbf16>, vector<64x32xf32> -> vector<64x32xf32>
    %c0_20 = arith.constant 0 : index
    %c0_21 = arith.constant 0 : index
    %27 = vector.load %arg9[%c0_20, %c0_21] : memref<1x32xf32, #tpu.memory_space<vmem>>, vector<1x32xf32>
    %28 = vector.broadcast %27 : vector<1x32xf32> to vector<64x32xf32>
    %29 = arith.addf %26, %28 : vector<64x32xf32>
    %cst_22 = arith.constant 0.000000e+00 : f32
    %30 = vector.broadcast %cst_22 : f32 to vector<64x32xf32>
    %31 = arith.maximumf %29, %30 : vector<64x32xf32>
    %cst_23 = arith.constant 0.000000e+00 : f32
    %32 = vector.broadcast %cst_23 : f32 to vector<8x8xf32>
    %33 = vector.extract_strided_slice %31 {offsets = [0, 0], sizes = [8, 32], strides = [1, 1]} : vector<64x32xf32> to vector<8x32xf32>
    %c0_24 = arith.constant 0 : index
    %c0_25 = arith.constant 0 : index
    %c0_26 = arith.constant 0 : index
    %34 = vector.load %arg10[%c0_24, %c0_25, %c0_26] : memref<8x32x8xf32, #tpu.memory_space<vmem>>, vector<1x32x8xf32>
    %35 = vector.shape_cast %34 : vector<1x32x8xf32> to vector<32x8xf32>
    %cst_27 = arith.constant dense<0.000000e+00> : vector<8x8xf32>
    %36 = tpu.matmul %33, %35, %cst_27 {dimension_numbers = #tpu.dot_dimension_numbers<[1], [0], [0], [1], [0, 0, 1, 1], [], []>} : vector<8x32xf32>, vector<32x8xf32>, vector<8x8xf32> -> vector<8x8xf32>
    %37 = arith.addf %32, %36 : vector<8x8xf32>
    %38 = vector.extract_strided_slice %31 {offsets = [8, 0], sizes = [8, 32], strides = [1, 1]} : vector<64x32xf32> to vector<8x32xf32>
    %c1 = arith.constant 1 : index
    %c0_28 = arith.constant 0 : index
    %c0_29 = arith.constant 0 : index
    %39 = vector.load %arg10[%c1, %c0_28, %c0_29] : memref<8x32x8xf32, #tpu.memory_space<vmem>>, vector<1x32x8xf32>
    %40 = vector.shape_cast %39 : vector<1x32x8xf32> to vector<32x8xf32>
    %cst_30 = arith.constant dense<0.000000e+00> : vector<8x8xf32>
    %41 = tpu.matmul %38, %40, %cst_30 {dimension_numbers = #tpu.dot_dimension_numbers<[1], [0], [0], [1], [0, 0, 1, 1], [], []>} : vector<8x32xf32>, vector<32x8xf32>, vector<8x8xf32> -> vector<8x8xf32>
    %42 = arith.addf %37, %41 : vector<8x8xf32>
    %43 = vector.extract_strided_slice %31 {offsets = [16, 0], sizes = [8, 32], strides = [1, 1]} : vector<64x32xf32> to vector<8x32xf32>
    %c2 = arith.constant 2 : index
    %c0_31 = arith.constant 0 : index
    %c0_32 = arith.constant 0 : index
    %44 = vector.load %arg10[%c2, %c0_31, %c0_32] : memref<8x32x8xf32, #tpu.memory_space<vmem>>, vector<1x32x8xf32>
    %45 = vector.shape_cast %44 : vector<1x32x8xf32> to vector<32x8xf32>
    %cst_33 = arith.constant dense<0.000000e+00> : vector<8x8xf32>
    %46 = tpu.matmul %43, %45, %cst_33 {dimension_numbers = #tpu.dot_dimension_numbers<[1], [0], [0], [1], [0, 0, 1, 1], [], []>} : vector<8x32xf32>, vector<32x8xf32>, vector<8x8xf32> -> vector<8x8xf32>
    %47 = arith.addf %42, %46 : vector<8x8xf32>
    %48 = vector.extract_strided_slice %31 {offsets = [24, 0], sizes = [8, 32], strides = [1, 1]} : vector<64x32xf32> to vector<8x32xf32>
    %c3 = arith.constant 3 : index
    %c0_34 = arith.constant 0 : index
    %c0_35 = arith.constant 0 : index
    %49 = vector.load %arg10[%c3, %c0_34, %c0_35] : memref<8x32x8xf32, #tpu.memory_space<vmem>>, vector<1x32x8xf32>
    %50 = vector.shape_cast %49 : vector<1x32x8xf32> to vector<32x8xf32>
    %cst_36 = arith.constant dense<0.000000e+00> : vector<8x8xf32>
    %51 = tpu.matmul %48, %50, %cst_36 {dimension_numbers = #tpu.dot_dimension_numbers<[1], [0], [0], [1], [0, 0, 1, 1], [], []>} : vector<8x32xf32>, vector<32x8xf32>, vector<8x8xf32> -> vector<8x8xf32>
    %52 = arith.addf %47, %51 : vector<8x8xf32>
    %53 = vector.extract_strided_slice %31 {offsets = [32, 0], sizes = [8, 32], strides = [1, 1]} : vector<64x32xf32> to vector<8x32xf32>
    %c4 = arith.constant 4 : index
    %c0_37 = arith.constant 0 : index
    %c0_38 = arith.constant 0 : index
    %54 = vector.load %arg10[%c4, %c0_37, %c0_38] : memref<8x32x8xf32, #tpu.memory_space<vmem>>, vector<1x32x8xf32>
    %55 = vector.shape_cast %54 : vector<1x32x8xf32> to vector<32x8xf32>
    %cst_39 = arith.constant dense<0.000000e+00> : vector<8x8xf32>
    %56 = tpu.matmul %53, %55, %cst_39 {dimension_numbers = #tpu.dot_dimension_numbers<[1], [0], [0], [1], [0, 0, 1, 1], [], []>} : vector<8x32xf32>, vector<32x8xf32>, vector<8x8xf32> -> vector<8x8xf32>
    %57 = arith.addf %52, %56 : vector<8x8xf32>
    %58 = vector.extract_strided_slice %31 {offsets = [40, 0], sizes = [8, 32], strides = [1, 1]} : vector<64x32xf32> to vector<8x32xf32>
    %c5 = arith.constant 5 : index
    %c0_40 = arith.constant 0 : index
    %c0_41 = arith.constant 0 : index
    %59 = vector.load %arg10[%c5, %c0_40, %c0_41] : memref<8x32x8xf32, #tpu.memory_space<vmem>>, vector<1x32x8xf32>
    %60 = vector.shape_cast %59 : vector<1x32x8xf32> to vector<32x8xf32>
    %cst_42 = arith.constant dense<0.000000e+00> : vector<8x8xf32>
    %61 = tpu.matmul %58, %60, %cst_42 {dimension_numbers = #tpu.dot_dimension_numbers<[1], [0], [0], [1], [0, 0, 1, 1], [], []>} : vector<8x32xf32>, vector<32x8xf32>, vector<8x8xf32> -> vector<8x8xf32>
    %62 = arith.addf %57, %61 : vector<8x8xf32>
    %63 = vector.extract_strided_slice %31 {offsets = [48, 0], sizes = [8, 32], strides = [1, 1]} : vector<64x32xf32> to vector<8x32xf32>
    %c6 = arith.constant 6 : index
    %c0_43 = arith.constant 0 : index
    %c0_44 = arith.constant 0 : index
    %64 = vector.load %arg10[%c6, %c0_43, %c0_44] : memref<8x32x8xf32, #tpu.memory_space<vmem>>, vector<1x32x8xf32>
    %65 = vector.shape_cast %64 : vector<1x32x8xf32> to vector<32x8xf32>
    %cst_45 = arith.constant dense<0.000000e+00> : vector<8x8xf32>
    %66 = tpu.matmul %63, %65, %cst_45 {dimension_numbers = #tpu.dot_dimension_numbers<[1], [0], [0], [1], [0, 0, 1, 1], [], []>} : vector<8x32xf32>, vector<32x8xf32>, vector<8x8xf32> -> vector<8x8xf32>
    %67 = arith.addf %62, %66 : vector<8x8xf32>
    %68 = vector.extract_strided_slice %31 {offsets = [56, 0], sizes = [8, 32], strides = [1, 1]} : vector<64x32xf32> to vector<8x32xf32>
    %c7 = arith.constant 7 : index
    %c0_46 = arith.constant 0 : index
    %c0_47 = arith.constant 0 : index
    %69 = vector.load %arg10[%c7, %c0_46, %c0_47] : memref<8x32x8xf32, #tpu.memory_space<vmem>>, vector<1x32x8xf32>
    %70 = vector.shape_cast %69 : vector<1x32x8xf32> to vector<32x8xf32>
    %cst_48 = arith.constant dense<0.000000e+00> : vector<8x8xf32>
    %71 = tpu.matmul %68, %70, %cst_48 {dimension_numbers = #tpu.dot_dimension_numbers<[1], [0], [0], [1], [0, 0, 1, 1], [], []>} : vector<8x32xf32>, vector<32x8xf32>, vector<8x8xf32> -> vector<8x8xf32>
    %72 = arith.addf %67, %71 : vector<8x8xf32>
    %c0_49 = arith.constant 0 : index
    %c0_50 = arith.constant 0 : index
    %73 = vector.load %arg11[%c0_49, %c0_50] : memref<1x8xf32, #tpu.memory_space<vmem>>, vector<1x8xf32>
    %74 = vector.broadcast %73 : vector<1x8xf32> to vector<8x8xf32>
    %75 = arith.addf %72, %74 : vector<8x8xf32>
    %c0_51 = arith.constant 0 : index
    %c0_52 = arith.constant 0 : index
    %76 = vector.load %arg12[%c0_51, %c0_52] : memref<8x8xf32, #tpu.memory_space<vmem>>, vector<8x8xf32>
    tpu.vector_store %arg12[%c0_51, %c0_52], %75 {strides = array<i32>} : memref<8x8xf32, #tpu.memory_space<vmem>>, vector<8x8xf32>,
    return
  }
  func.func @transform_0(%arg0: i32) -> (i32, i32) {
    %c0_i32 = arith.constant 0 : i32
    %c0_i32_0 = arith.constant 0 : i32
    return %arg0, %c0_i32 : i32, i32
  }
  func.func @transform_1(%arg0: i32) -> (i32, i32) {
    %c0_i32 = arith.constant 0 : i32
    %c0_i32_0 = arith.constant 0 : i32
    %c0_i32_1 = arith.constant 0 : i32
    return %c0_i32, %c0_i32_0 : i32, i32
  }
  func.func @transform_2(%arg0: i32) -> (i32, i32) {
    %c0_i32 = arith.constant 0 : i32
    %c0_i32_0 = arith.constant 0 : i32
    %c0_i32_1 = arith.constant 0 : i32
    return %c0_i32, %c0_i32_0 : i32, i32
  }
  func.func @transform_3(%arg0: i32) -> (i32, i32) {
    %c0_i32 = arith.constant 0 : i32
    %c0_i32_0 = arith.constant 0 : i32
    %c0_i32_1 = arith.constant 0 : i32
    return %c0_i32, %c0_i32_0 : i32, i32
  }
  func.func @transform_4(%arg0: i32) -> (i32, i32) {
    %c0_i32 = arith.constant 0 : i32
    %c0_i32_0 = arith.constant 0 : i32
    %c0_i32_1 = arith.constant 0 : i32
    return %c0_i32, %c0_i32_0 : i32, i32
  }
  func.func @transform_5(%arg0: i32) -> (i32, i32) {
    %c0_i32 = arith.constant 0 : i32
    %c0_i32_0 = arith.constant 0 : i32
    %c0_i32_1 = arith.constant 0 : i32
    return %c0_i32, %c0_i32_0 : i32, i32
  }
  func.func @transform_6(%arg0: i32) -> (i32, i32) {
    %c0_i32 = arith.constant 0 : i32
    %c0_i32_0 = arith.constant 0 : i32
    %c0_i32_1 = arith.constant 0 : i32
    return %c0_i32, %c0_i32_0 : i32, i32
  }
  func.func @transform_7(%arg0: i32) -> (i32, i32) {
    %c0_i32 = arith.constant 0 : i32
    %c0_i32_0 = arith.constant 0 : i32
    %c0_i32_1 = arith.constant 0 : i32
    return %c0_i32, %c0_i32_0 : i32, i32
  }
  func.func @transform_8(%arg0: i32) -> (i32, i32) {
    %c0_i32 = arith.constant 0 : i32
    %c0_i32_0 = arith.constant 0 : i32
    %c0_i32_1 = arith.constant 0 : i32
    return %c0_i32, %c0_i32_0 : i32, i32
  }
  func.func @transform_9(%arg0: i32) -> (i32, i32, i32) {
    %c0_i32 = arith.constant 0 : i32
    %c0_i32_0 = arith.constant 0 : i32
    %c0_i32_1 = arith.constant 0 : i32
    %c0_i32_2 = arith.constant 0 : i32
    return %c0_i32, %c0_i32_0, %c0_i32_1 : i32, i32, i32
  }
  func.func @transform_10(%arg0: i32) -> (i32, i32) {
    %c0_i32 = arith.constant 0 : i32
    %c0_i32_0 = arith.constant 0 : i32
    %c0_i32_1 = arith.constant 0 : i32
    return %c0_i32, %c0_i32_0 : i32, i32
  }
  func.func @transform_11(%arg0: i32) -> (i32, i32) {
    %c0_i32 = arith.constant 0 : i32
    %c0_i32_0 = arith.constant 0 : i32
    return %arg0, %c0_i32 : i32, i32
  }
}

</mosaic_0001>

<bundles_post_ra>
// kernel: tpu_custom_call.1
= control target key start
LH: loop header
LB: loop body
LE: loop exit
PB: predicated region body
PF: predicated region fallthrough
CT: control target
= control target key end

     0   :  { %s2111_s17 = smov 0   ;;  %s2488_s0 = inlined_call_operand.vmem [shape: f32[128,1], index: 0, kind: input, shape index: {}]   ;;  %s2489_s1 = inlined_call_operand.vmem [shape: f32[64,125], index: 1, kind: input, shape index: {}]   ;;  %s2490_s2 = inlined_call_operand.vmem [shape: f32[64,125], index: 2, kind: input, shape index: {}]   ;;  %s2491_s3 = inlined_call_operand.vmem [shape: bf16[125,200], index: 3, kind: input, shape index: {}]   ;;  %s2492_s4 = inlined_call_operand.vmem [shape: f32[1,200], index: 4, kind: input, shape index: {}]   ;;  %s2493_s5 = inlined_call_operand.vmem [shape: bf16[200,80], index: 5, kind: input, shape index: {}]   ;;  %s2494_s6 = inlined_call_operand.vmem [shape: f32[1,80], index: 6, kind: input, shape index: {}]   ;;  %s2495_s7 = inlined_call_operand.vmem [shape: bf16[80,32], index: 7, kind: input, shape index: {}]   ;;  %s2496_s8 = inlined_call_operand.vmem [shape: f32[1,32], index: 8, kind: input, shape index: {}]   ;;  %s2497_s9 = inlined_call_operand.vmem [shape: f32[8,32,8], index: 9, kind: input, shape index: {}]   ;;  %s2498_s10 = inlined_call_operand.vmem [shape: f32[1,8], index: 10, kind: input, shape index: {}]   ;;  %s2499_s11 = inlined_call_operand.vmem [shape: f32[16,8], index: 11, kind: output, shape index: {}]  }
   0x1 LB: > { %s2117_s18 = sadd.s32 4294967295, %s2045_s17   ;;  %p1737_p0 = scmp.ge.s32.totalorder %s2045_s17, 1  ;;  %s2045_s17 = sphi %s2111_s17, %s21_s17  }
   0x2   : > { %p338_p1 = scmp.lt.s32.totalorder %s2045_s17, 3 }
   0x4   : > { %p339_p2 = pnand %p1737_p0, %p338_p1 }
   0x5   : > { %s1738_s19 = sshll.u32 (!%p339_p2), %s2117_s18, 3  ;;  %p383_p4 = scmp.lt.s32.totalorder (!%p339_p2), %s2117_s18, 1 }
   0x6   : > { %342 = sbr.rel (%p339_p2) target bundleno = 998 (0x3e6), region = 64  ;;  %p378_p3 = scmp.lt.s32.totalorder (!%p339_p2), %s1738_s19, 15 }
   0xb   : > { %vm599_vm0 = vcmask 1045504   ;;  %v2047_v0 = vmov 0   ;;  %v1997_v1 = vld [vmem:[%s2491_s3 + $0x74] ss:$8 sps:$4 sm:$0x7f]   ;;  %vm600_vm1 = vcmask 1046528  }
   0xc   : > { %1996 = vset.pattern.permute.xlu1 %v2047_v0  ;;  %1995 = vset.pattern.permute.xlu0 %v2047_v0  ;;  %v2048_v2 = vmov 65535   ;;  %v1999_v4 = vld [vmem:[%s2491_s3 + $0x70] ss:$8 sps:$4 sm:$0x7f]   ;;  %s2501_s19 = smov (!%p378_p3, %s1738_s19), 15  ;;  %v2023_v32 = vld [vmem:[%s2493_s5 + $0x28] sm:$0xff]  }
   0xd   : > { %v601_v3 = vsel %vm599_vm0, 4294967295, %v2048_v2  ;;  %641 = vmatprep.mubr.bf16.mxu0 %v2047_v0  ;;  %830 = vmatprep.subr.bf16.mxu1 %v2047_v0  ;;  %s1739_s24 = sshll.u32 %s2501_s19, 3  ;;  %v2000_v8 = vld [vmem:[%s2491_s3 + $0x64] ss:$8 sps:$4 sm:$0xff]   ;;  %v2002_v11 = vld [vmem:[%s2491_s3 + $0x60] ss:$8 sps:$4 sm:$0xff]  }
   0xe   : > { %v602_v5 = vsel %vm600_vm1, %v601_v3, 0  ;;  %s381_s29 = scalar_lea.vmem %s2488_s0, %s1739_s24  ;;  %v2003_v12 = vld [vmem:[%s2491_s3 + $0x54] ss:$8 sps:$4 sm:$0xff]   ;;  %v2005_v15 = vld [vmem:[%s2491_s3 + $0x50] ss:$8 sps:$4 sm:$0xff]   ;;  %v2024_v33 = vld [vmem:[%s2493_s5 + $0x20] sm:$0xff]  }
   0xf   : > { %v607_v6 = vand.u32 %v1997_v1, %v602_v5  ;;  %v604_v7 = vand.u32 %v1999_v4, %v602_v5  ;;  %v390_v9 = vld [vmem:[%s381_s29 + $0x10] sm:$0xff]  ;;  %v388_v10 = vld [vmem:[%s381_s29] sm:$0xff]  ;;  %v391_v13 = vld [vmem:[%s381_s29 + $0x18] sm:$0xff]  ;;  %vm826_vm2 = vcmask 1043456   ;;  %vm586_vm3 = vcmask 1022976   ;;  %s2503_s18 = smov (!%p383_p4, %s2117_s18), 1 }
  0x10   : > { %416 = vperm.xlu1 %1996, %v390_v9   ;;  %406 = vperm.xlu0 %1995, %v388_v10   ;;  %v389_v14 = vld [vmem:[%s381_s29 + $0x8] sm:$0xff]  ;;  %v392_v17 = vld [vmem:[%s381_s29 + $0x20] sm:$0xff]  ;;  %v395_v20 = vld [vmem:[%s381_s29 + $0x38] sm:$0xff]  ;;  %vm813_vm4 = vcmask 588800   ;;  %vm954_vm5 = vcmask 654336   ;;  %vm2050_vm6 = vmmov 0  }
  0x11   : > { %609 = vmatprep.subr.bf16.mxu0 %v607_v6  ;;  %v393_v16 = vld [vmem:[%s381_s29 + $0x28] sm:$0xff]  ;;  %v394_v21 = vld [vmem:[%s381_s29 + $0x30] sm:$0xff]  ;;  %v2021_v30 = vld [vmem:[%s2493_s5 + $0x38] sm:$0xff]   ;;  %vm1049_vm7 = vcmask 261120   ;;  %s1740_s24 = sshll.u32 %s2503_s18, 3  ;;  %vm1678_vm8 = vcmask 64512  }
  0x12   : > { %610 = vmatpush1.bf16.msra.mxu0 %v604_v7  ;;  %v2006_v18 = vld [vmem:[%s2491_s3 + $0x44] ss:$8 sps:$4 sm:$0xff]   ;;  %v2008_v19 = vld [vmem:[%s2491_s3 + $0x40] ss:$8 sps:$4 sm:$0xff]   ;;  %v2009_v22 = vld [vmem:[%s2491_s3 + $0x34] ss:$8 sps:$4 sm:$0xff]   ;;  %831 = vmatpush1.bf16.msra.mxu1 %v2021_v30  ;;  %s386_s30 = scalar_lea.vmem %s2499_s11, %s1740_s24 }
  0x13   : > { %611 = vmatprep.subr.bf16.mxu0 %v2000_v8  ;;  %v2011_v23 = vld [vmem:[%s2491_s3 + $0x30] ss:$8 sps:$4 sm:$0xff]   ;;  %v2012_v24 = vld [vmem:[%s2491_s3 + $0x24] ss:$8 sps:$4 sm:$0xff]   ;;  %v2014_v25 = vld [vmem:[%s2491_s3 + $0x20] ss:$8 sps:$4 sm:$0xff]   ;;  %832 = vmatprep.subr.bf16.mxu1 %v2047_v0 }
  0x14   : > { %421 = vperm.xlu1 %1996, %v391_v13   ;;  %411 = vperm.xlu0 %1995, %v389_v14   ;;  %v2015_v26 = vld [vmem:[%s2491_s3 + $0x14] ss:$8 sps:$4 sm:$0xff]   ;;  %v2017_v27 = vld [vmem:[%s2491_s3 + $0x10] ss:$8 sps:$4 sm:$0xff]   ;;  %v2018_v28 = vld [vmem:[%s2491_s3 + $0x4] ss:$8 sps:$4 sm:$0xff]  }
  0x15   : > { %v2020_v29 = vld [vmem:[%s2491_s3] ss:$8 sps:$4 sm:$0xff]   ;;  %v2022_v31 = vld [vmem:[%s2493_s5 + $0x30] sm:$0xff]   ;;  %v2025_v34 = vld [vmem:[%s2493_s5 + $0x18] sm:$0xff]  }
  0x16   : > { %612 = vmatpush1.bf16.msra.mxu0 %v2002_v11  ;;  %833 = vmatpush1.bf16.msra.mxu1 %v2022_v31  ;;  %v2026_v35 = vld [vmem:[%s2493_s5 + $0x10] sm:$0xff]   ;;  %v2027_v36 = vld [vmem:[%s2493_s5 + $0x8] sm:$0xff]   ;;  %v2028_v37 = vld [vmem:[%s2493_s5] sm:$0xff]  }
  0x17   : > { %613 = vmatprep.subr.bf16.mxu0 %v2003_v12  ;;  %834 = vmatprep.subr.bf16.mxu1 %v2047_v0  ;;  %v2029_v38 = vld [vmem:[%s2493_s5 + $0x60] ss:$0 sps:$4 sm:$0xff]   ;;  %v2030_v40 = vld [vmem:[%s2493_s5 + $0x58] sm:$0xff]   ;;  %v397_v46 = vld [vmem:[%s2489_s1 + $0x8] sm:$0xff] }
  0x18   : > { %431 = vperm.xlu1 %1996, %v393_v16   ;;  %426 = vperm.xlu0 %1995, %v392_v17   ;;  %v828_v39 = vsel %vm826_vm2, %v2029_v38, 0  ;;  %v396_v41 = vld [vmem:[%s2489_s1] sm:$0xff]  ;;  %v398_v47 = vld [vmem:[%s2489_s1 + $0x10] sm:$0xff]  ;;  %v399_v48 = vld [vmem:[%s2489_s1 + $0x18] sm:$0xff] }
  0x19   : > { %v452_v45 = vld [vmem:[%s2490_s2] sm:$0xff]  ;;  %v453_v49 = vld [vmem:[%s2490_s2 + $0x8] sm:$0xff]  ;;  %v454_v57 = vld [vmem:[%s2490_s2 + $0x10] sm:$0xff] }
  0x1a   : > { %614 = vmatpush1.bf16.msra.mxu0 %v2005_v15  ;;  %835 = vmatpush1.bf16.msra.mxu1 %v2023_v32  ;;  %v455_v58 = vld [vmem:[%s2490_s2 + $0x18] sm:$0xff]  ;;  %v401_v1 = vld [vmem:[%s2489_s1 + $0x28] sm:$0xff]  ;;  %v400_v3 = vld [vmem:[%s2489_s1 + $0x20] sm:$0xff] }
  0x1b   : > { %615 = vmatprep.subr.bf16.mxu0 %v2006_v18  ;;  %836 = vmatprep.subr.bf16.mxu1 %v2047_v0  ;;  %v457_v9 = vld [vmem:[%s2490_s2 + $0x28] sm:$0xff]  ;;  %v456_v10 = vld [vmem:[%s2490_s2 + $0x20] sm:$0xff]  ;;  %v403_v14 = vld [vmem:[%s2489_s1 + $0x38] sm:$0xff] }
  0x1c   : > { %441 = vperm.xlu1 %1996, %v395_v20   ;;  %436 = vperm.xlu0 %1995, %v394_v21   ;;  %v402_v16 = vld [vmem:[%s2489_s1 + $0x30] sm:$0xff]  ;;  %v2032_v31 = vld [vmem:[%s2493_s5 + $0x48] sm:$0xff]   ;;  %v2033_v32 = vld [vmem:[%s2493_s5 + $0x40] sm:$0xff]  }
  0x1d   : > { %v2031_v30 = vld [vmem:[%s2493_s5 + $0x50] sm:$0xff]  }
  0x1e   : > { %616 = vmatpush1.bf16.msra.mxu0 %v2008_v19  ;;  %837 = vmatpush1.bf16.msra.mxu1 %v2024_v33  ;;  %v2034_v33 = vld [vmem:[%s2495_s7 + $0x20] sm:$0xff]  }
  0x1f   : > { %617 = vmatprep.subr.bf16.mxu0 %v2009_v22  ;;  %838 = vmatprep.subr.bf16.mxu1 %v2047_v0  ;;  %v459_v22 = vld [vmem:[%s2490_s2 + $0x38] sm:$0xff] }
  0x22   : > { %618 = vmatpush1.bf16.msra.mxu0 %v2011_v23  ;;  %839 = vmatpush1.bf16.msra.mxu1 %v2025_v34  ;;  %v458_v23 = vld [vmem:[%s2490_s2 + $0x30] sm:$0xff]  ;;  %v2035_v34 = vld [vmem:[%s2495_s7 + $0x18] sm:$0xff]  }
  0x23   : > { %619 = vmatprep.subr.bf16.mxu0 %v2012_v24  ;;  %840 = vmatprep.subr.bf16.mxu1 %v2047_v0 }
  0x26   : > { %620 = vmatpush1.bf16.msra.mxu0 %v2014_v25  ;;  %841 = vmatpush1.bf16.msra.mxu1 %v2026_v35  ;;  %v498_v35 = vlaneseq }
  0x27   : > { %621 = vmatprep.subr.bf16.mxu0 %v2015_v26  ;;  %842 = vmatprep.subr.bf16.mxu1 %v2047_v0 }
  0x2a   : > { %622 = vmatpush1.bf16.msra.mxu0 %v2017_v27  ;;  %843 = vmatpush1.bf16.msra.mxu1 %v2027_v36  ;;  %v499_v36 = vshrl.u32 %v498_v35, 7  ;;  %v2038_v35 = vld [vmem:[%s2495_s7] sm:$0xff]  }
  0x2b   : > { %623 = vmatprep.subr.bf16.mxu0 %v2018_v28  ;;  %844 = vmatprep.subr.bf16.mxu1 %v2047_v0 }
  0x2c   : > { %v500_v38 = vsub.s32 0, %v499_v36 }
  0x2e   : > { %624 = vmatpush1.bf16.msra.mxu0 %v2020_v29  ;;  %845 = vmatpush1.bf16.msra.mxu1 %v2028_v37  ;;  %v504_v37 = vsub.s32 1, %v499_v36  ;;  %v1043_v36 = vld [vmem:[%s2497_s9 + $0x18] sm:$0xff] }
  0x2f   : > { %852 = vmatprep.subr.bf16.mxu1 %v2047_v0  ;;  %1877 = vmatprep.subr.bf16.mxu0 %v2034_v33 }
  0x32   : > { %853 = vmatpush2.bf16.msra.mxu1 %v828_v39  ;;  %v496_v39 = vld [vmem:[%s2492_s4] sm:$0x3] }
  0x33   : > { %854 = vmatprep.subr.bf16.mxu1 %v2047_v0 }
  0x36   : > { %855 = vmatpush2.bf16.msra.mxu1 %v2030_v40 }
  0x37   : > { %856 = vmatprep.subr.bf16.mxu1 %v2047_v0 }
  0x3a   : > { %857 = vmatpush2.bf16.msra.mxu1 %v2031_v30 }
  0x3b   : > { %858 = vmatprep.subr.bf16.mxu1 %v2047_v0 }
  0x3e   : > { %859 = vmatpush2.bf16.msra.mxu1 %v2032_v31 }
  0x3f   : > { %860 = vmatprep.subr.bf16.mxu1 %v2047_v0 }
  0x42   : > { %861 = vmatpush2.bf16.msra.mxu1 %v2033_v32 }
  0x8b   : > { %v417_v42 = vpop.permute.xlu1 %416  ;;  %v407_v43 = vpop.permute.xlu0 %406 }
  0x8c   : > { %v444_v44 = vmul.f32 %v407_v43, %v396_v41  ;;  %v446_v54 = vmul.f32 %v417_v42, %v398_v47  ;;  %v505_v41 = vrot.slane %v496_v39, %v504_v37  ;;  %v501_v42 = vrot.slane %v496_v39, %v500_v38  ;;  %v1042_v38 = vld [vmem:[%s2497_s9 + $0x10] sm:$0xff]  ;;  %v1041_v39 = vld [vmem:[%s2497_s9 + $0x8] sm:$0xff] }
  0x8d   : > { %v2049_v37 = vmov 0.0  }
  0x8e   : > { %v460_v51 = vadd.f32 %v452_v45, %v444_v44  ;;  %v462_v61 = vadd.f32 %v454_v57, %v446_v54  ;;  %1906 = vmatprep.subr.mxu1 %v2049_v37 }
  0x8f   : > { %v412_v50 = vpop.permute.xlu0 %411  ;;  %v422_v53 = vpop.permute.xlu1 %421 }
  0x90   : > { %v445_v52 = vmul.f32 %v412_v50, %v397_v46  ;;  %v447_v55 = vmul.f32 %v422_v53, %v399_v48  ;;  %v468_v59 = vmax.f32 %v460_v51, 0.0  ;;  %v470_v5 = vmax.f32 %v462_v61, 0.0 }
  0x92   : > { %v461_v56 = vadd.f32 %v453_v49, %v445_v52  ;;  %v463_v62 = vadd.f32 %v455_v58, %v447_v55 }
  0x93   : > { %v432_v2 = vpop.permute.xlu1 %431  ;;  %v427_v4 = vpop.permute.xlu0 %426 }
  0x94   : > { %v469_v60 = vmax.f32 %v461_v56, 0.0  ;;  %v471_v6 = vmax.f32 %v463_v62, 0.0  ;;  %v449_v7 = vmul.f32 %v432_v2, %v401_v1  ;;  %v448_v8 = vmul.f32 %v427_v4, %v400_v3 }
  0x96   : > { %v476_v63 = vpack.c.bf16 %v469_v60, %v468_v59  ;;  %v477_v11 = vpack.c.bf16 %v471_v6, %v470_v5  ;;  %v465_v12 = vadd.f32 %v457_v9, %v449_v7  ;;  %v464_v13 = vadd.f32 %v456_v10, %v448_v8 }
  0x97   : > { %v442_v15 = vpop.permute.xlu1 %441  ;;  %v437_v17 = vpop.permute.xlu0 %436 }
  0x98   : > { %1757 = vmatmul.mubr.msk.bf16.vlgmr.msra.gmra.mxu0 %vm586_vm3, %v476_v63  ;;  %v473_v18 = vmax.f32 %v465_v12, 0.0  ;;  %v472_v19 = vmax.f32 %v464_v13, 0.0  ;;  %v451_v20 = vmul.f32 %v442_v15, %v403_v14  ;;  %v450_v21 = vmul.f32 %v437_v17, %v402_v16 }
  0x99   : > { %651 = vmatprep.mubr.bf16.mxu0 %v2047_v0  ;;  %1878 = vmatpush3.bf16.msra.mxu0 %v2034_v33 }
  0x9a   : > { %v478_v24 = vpack.c.bf16 %v473_v18, %v472_v19  ;;  %v467_v25 = vadd.f32 %v459_v22, %v451_v20  ;;  %v466_v26 = vadd.f32 %v458_v23, %v450_v21  ;;  %1879 = vmatprep.subr.bf16.mxu0 %v2035_v34 }
  0x9c   : > { %v475_v27 = vmax.f32 %v467_v25, 0.0  ;;  %v474_v28 = vmax.f32 %v466_v26, 0.0 }
  0x9d   : > { %1880 = vmatpush3.bf16.msra.mxu0 %v2035_v34 }
  0x9e   : > { %v479_v29 = vpack.c.bf16 %v475_v27, %v474_v28 }
  0xa0   : > { %1758 = vmatmul.mubr.msk.bf16.gmra.mxu0 %vm586_vm3, %v477_v11 }
  0xa1   : > { %661 = vmatprep.mubr.bf16.mxu0 %v2047_v0 }
  0xa8   : > { %1759 = vmatmul.mubr.msk.bf16.gmra.mxu0 %vm586_vm3, %v478_v24 }
  0xa9   : > { %671 = vmatprep.mubr.bf16.mxu0 %v2047_v0  ;;  %v2036_v0 = vld [vmem:[%s2495_s7 + $0x10] sm:$0xff]  }
  0xaa   : > { %1881 = vmatprep.subr.bf16.mxu0 %v2036_v0 }
  0xab   : > { %1882 = vmatpush3.bf16.msra.mxu0 %v2036_v0  ;;  %v2037_v0 = vld [vmem:[%s2495_s7 + $0x8] sm:$0xff]  }
  0xac   : > { %1883 = vmatprep.subr.bf16.mxu0 %v2037_v0 }
  0xaf   : > { %1884 = vmatpush3.bf16.msra.mxu0 %v2037_v0 }
  0xb0   : > { %1760 = vmatmul.mubr.msk.bf16.gmra.mxu0 %vm586_vm3, %v479_v29  ;;  %1885 = vmatprep.subr.bf16.mxu0 %v2038_v35 }
  0xb3   : > { %1886 = vmatpush3.bf16.msra.mxu0 %v2038_v35 }
  0xb4   : > { %1895 = vmatprep.subr.mxu0 %v2049_v37 }
 0x158   : > { %v643_v40 = vpop.f32.mrf.mxu0 }
 0x159   : > { %v644_v47 = vadd.f32 %v643_v40, %v501_v42  ;;  %v1761_v40 = vld [vmem:[%s2494_s6] ss:$0 sm:$0xff] }
 0x15a   : > { %v645_v43 = vpop.f32.mrf.mxu0 }
 0x15b   : > { %v646_v45 = vadd.f32 %v645_v43, %v505_v41  ;;  %v682_v54 = vmax.f32 %v644_v47, 0.0 }
 0x15c   : > { %v647_v44 = vpop.f32.mrf.mxu0 }
 0x15d   : > { %v648_v46 = vadd.f32 %v647_v44, %v501_v42  ;;  %v683_v52 = vmax.f32 %v646_v45, 0.0 }
 0x15e   : > { %v649_v48 = vpop.f32.mrf.mxu0 }
 0x15f   : > { %v650_v49 = vadd.f32 %v649_v48, %v505_v41  ;;  %v684_v50 = vmax.f32 %v648_v46, 0.0 }
 0x160   : > { %v653_v51 = vpop.f32.mrf.mxu0 }
 0x161   : > { %v685_v53 = vmax.f32 %v650_v49, 0.0  ;;  %v698_v57 = vpack.c.bf16 %v684_v50, %v682_v54  ;;  %v654_v61 = vadd.f32 %v653_v51, %v501_v42 }
 0x162   : > { %v655_v55 = vpop.f32.mrf.mxu0 }
 0x163   : > { %v699_v56 = vpack.c.bf16 %v685_v53, %v683_v52  ;;  %v656_v59 = vadd.f32 %v655_v55, %v505_v41  ;;  %v686_v5 = vmax.f32 %v654_v61, 0.0 }
 0x164   : > { %v657_v58 = vpop.f32.mrf.mxu0 }
 0x165   : > { %v658_v60 = vadd.f32 %v657_v58, %v501_v42  ;;  %1775 = vmatprep.mubr.msk.bf16.mxu1 %vm813_vm4, %v699_v56  ;;  %v687_v3 = vmax.f32 %v656_v59, 0.0 }
 0x166   : > { %v659_v62 = vpop.f32.mrf.mxu0  ;;  %863 = vmatmul.mubr.bf16.vlgmr.msra.gmra.mxu1 %v698_v57 }
 0x167   : > { %v660_v63 = vadd.f32 %v659_v62, %v505_v41  ;;  %v688_v1 = vmax.f32 %v658_v60, 0.0  ;;  %1907 = vmatpush3.msra.mxu1 %v1043_v36  ;;  %v1792_v60 = vld [vmem:[%s2497_s9 + $0x38] sm:$0xff]  ;;  %v1796_v36 = vld [vmem:[%s2497_s9 + $0x48] sm:$0xff] }
 0x168   : > { %v663_v2 = vpop.f32.mrf.mxu0  ;;  %1908 = vmatprep.subr.mxu1 %v2049_v37 }
 0x169   : > { %v689_v4 = vmax.f32 %v660_v63, 0.0  ;;  %v700_v8 = vpack.c.bf16 %v688_v1, %v686_v5  ;;  %v664_v12 = vadd.f32 %v663_v2, %v501_v42  ;;  %1909 = vmatpush3.msra.mxu1 %v1042_v38  ;;  %v1791_v63 = vld [vmem:[%s2497_s9 + $0x30] sm:$0xff]  ;;  %v1795_v38 = vld [vmem:[%s2497_s9 + $0x40] sm:$0xff] }
 0x16a   : > { %v665_v6 = vpop.f32.mrf.mxu0  ;;  %1910 = vmatprep.subr.mxu1 %v2049_v37 }
 0x16b   : > { %v701_v7 = vpack.c.bf16 %v689_v4, %v687_v3  ;;  %v666_v10 = vadd.f32 %v665_v6, %v505_v41  ;;  %v690_v19 = vmax.f32 %v664_v12, 0.0  ;;  %1911 = vmatpush3.msra.mxu1 %v1041_v39  ;;  %v1813_v39 = vld [vmem:[%s2497_s9 + $0xb8] sm:$0xff] }
 0x16c   : > { %v667_v9 = vpop.f32.mrf.mxu0  ;;  %1912 = vmatprep.subr.mxu1 %v2049_v37 }
 0x16d   : > { %v668_v11 = vadd.f32 %v667_v9, %v501_v42  ;;  %1776 = vmatprep.mubr.msk.bf16.mxu1 %vm813_vm4, %v701_v7  ;;  %v691_v17 = vmax.f32 %v666_v10, 0.0 }
 0x16e   : > { %v669_v13 = vpop.f32.mrf.mxu0  ;;  %871 = vmatmul.mubr.bf16.gmra.mxu1 %v700_v8 }
 0x16f   : > { %v670_v14 = vadd.f32 %v669_v13, %v505_v41  ;;  %v692_v15 = vmax.f32 %v668_v11, 0.0 }
 0x170   : > { %v673_v16 = vpop.f32.mrf.mxu0 }
 0x171   : > { %v693_v18 = vmax.f32 %v670_v14, 0.0  ;;  %v702_v22 = vpack.c.bf16 %v692_v15, %v690_v19  ;;  %v674_v26 = vadd.f32 %v673_v16, %v501_v42  ;;  %v1040_v16 = vld [vmem:[%s2497_s9] sm:$0xff] }
 0x172   : > { %v675_v20 = vpop.f32.mrf.mxu0  ;;  %1913 = vmatpush3.msra.mxu1 %v1040_v16 }
 0x173   : > { %v703_v21 = vpack.c.bf16 %v693_v18, %v691_v17  ;;  %v676_v24 = vadd.f32 %v675_v20, %v505_v41  ;;  %v694_v32 = vmax.f32 %v674_v26, 0.0  ;;  %v1790_v17 = vld [vmem:[%s2497_s9 + $0x28] sm:$0xff]  ;;  %1928 = vmatprep.subr.mxu1 %v2049_v37  ;;  %v1789_v18 = vld [vmem:[%s2497_s9 + $0x20] sm:$0xff] }
 0x174   : > { %v677_v23 = vpop.f32.mrf.mxu0  ;;  %v2353_v20 = vld [vmem:[%s2496_s8] ss:$0 sm:$0xff] }
 0x175   : > { %v678_v25 = vadd.f32 %v677_v23, %v501_v42  ;;  %1777 = vmatprep.mubr.msk.bf16.mxu1 %vm813_vm4, %v703_v21  ;;  %v695_v30 = vmax.f32 %v676_v24, 0.0 }
 0x176   : > { %v679_v27 = vpop.f32.mrf.mxu0  ;;  %879 = vmatmul.mubr.bf16.gmra.mxu1 %v702_v22 }
 0x177   : > { %v680_v28 = vadd.f32 %v679_v27, %v505_v41  ;;  %v696_v29 = vmax.f32 %v678_v25, 0.0  ;;  %v1803_v25 = vld [vmem:[%s2497_s9 + $0x78] sm:$0xff] }
 0x179   : > { %v697_v31 = vmax.f32 %v680_v28, 0.0  ;;  %v704_v34 = vpack.c.bf16 %v696_v29, %v694_v32  ;;  %v1802_v28 = vld [vmem:[%s2497_s9 + $0x70] sm:$0xff]  ;;  %v1801_v32 = vld [vmem:[%s2497_s9 + $0x68] sm:$0xff] }
 0x17b   : > { %v705_v33 = vpack.c.bf16 %v697_v31, %v695_v30  ;;  %v1798_v31 = vld [vmem:[%s2497_s9 + $0x58] sm:$0xff] }
 0x17d   : > { %1778 = vmatprep.mubr.msk.bf16.mxu1 %vm813_vm4, %v705_v33  ;;  %v1797_v33 = vld [vmem:[%s2497_s9 + $0x50] sm:$0xff] }
 0x17e   : > { %887 = vmatmul.mubr.bf16.gmra.mxu1 %v704_v34  ;;  %v1800_v34 = vld [vmem:[%s2497_s9 + $0x60] sm:$0xff] }
 0x17f   : > { %1914 = vmatprep.mubr.msk.f32.mxu1 %vm2050_vm6, %v2049_v37 }
 0x226   : > { %v864_v41 = vpop.f32.mrf.mxu1 }
 0x227   : > { %v865_v43 = vadd.f32 %v1761_v40, %v864_v41 }
 0x228   : > { %v866_v42 = vpop.f32.mrf.mxu1 }
 0x229   : > { %v895_v47 = vmax.f32 %v865_v43, 0.0  ;;  %v1808_v42 = vld [vmem:[%s2497_s9 + $0x98] sm:$0xff] }
 0x22a   : > { %v867_v44 = vpop.f32.mrf.mxu1 }
 0x22b   : > { %v868_v45 = vadd.f32 %v1761_v40, %v867_v44  ;;  %v1812_v44 = vld [vmem:[%s2497_s9 + $0xb0] sm:$0xff] }
 0x22c   : > { %v869_v46 = vpop.f32.mrf.mxu1 }
 0x22d   : > { %v896_v48 = vmax.f32 %v868_v45, 0.0  ;;  %v1807_v45 = vld [vmem:[%s2497_s9 + $0x90] sm:$0xff] }
 0x22e   : > { %v872_v49 = vpop.f32.mrf.mxu1 }
 0x22f   : > { %v903_v50 = vpack.c.bf16 %v896_v48, %v895_v47  ;;  %v873_v52 = vadd.f32 %v1761_v40, %v872_v49  ;;  %v1811_v47 = vld [vmem:[%s2497_s9 + $0xa8] sm:$0xff] }
 0x230   : > { %v874_v51 = vpop.f32.mrf.mxu1  ;;  %v1806_v49 = vld [vmem:[%s2497_s9 + $0x88] sm:$0xff] }
 0x231   : > { %1887 = vmatprep.mubr.msk.bf16.mxu0 %vm954_vm5, %v903_v50  ;;  %v897_v56 = vmax.f32 %v873_v52, 0.0  ;;  %v1805_v52 = vld [vmem:[%s2497_s9 + $0x80] sm:$0xff] }
 0x232   : > { %v875_v53 = vpop.f32.mrf.mxu1 }
 0x233   : > { %v876_v54 = vadd.f32 %v1761_v40, %v875_v53  ;;  %v1810_v53 = vld [vmem:[%s2497_s9 + $0xa0] sm:$0xff] }
 0x234   : > { %v877_v55 = vpop.f32.mrf.mxu1 }
 0x235   : > { %v898_v57 = vmax.f32 %v876_v54, 0.0 }
 0x236   : > { %v880_v58 = vpop.f32.mrf.mxu1 }
 0x237   : > { %v904_v59 = vpack.c.bf16 %v898_v57, %v897_v56  ;;  %v881_v62 = vadd.f32 %v1761_v40, %v880_v58  ;;  %v1818_v56 = vld [vmem:[%s2497_s9 + $0xd8] sm:$0xff]  ;;  %v1817_v58 = vld [vmem:[%s2497_s9 + $0xd0] sm:$0xff] }
 0x238   : > { %v882_v61 = vpop.f32.mrf.mxu1  ;;  %v1823_v57 = vld [vmem:[%s2497_s9 + $0xf8] sm:$0xff] }
 0x239   : > { %1888 = vmatmul.mubr.msk.bf16.vlgmr.msra.gmra.mxu0 %vm954_vm5, %v904_v59  ;;  %v899_v4 = vmax.f32 %v881_v62, 0.0  ;;  %v1822_v59 = vld [vmem:[%s2497_s9 + $0xf0] sm:$0xff]  ;;  %v1821_v62 = vld [vmem:[%s2497_s9 + $0xe8] sm:$0xff] }
 0x23a   : > { %v883_v1 = vpop.f32.mrf.mxu1  ;;  %1896 = vmatpush3.msra.mxu0 %v1792_v60  ;;  %v1816_v60 = vld [vmem:[%s2497_s9 + $0xc8] sm:$0xff] }
 0x23b   : > { %v884_v2 = vadd.f32 %v1761_v40, %v883_v1  ;;  %1897 = vmatprep.subr.mxu0 %v2049_v37  ;;  %v1815_v1 = vld [vmem:[%s2497_s9 + $0xc0] sm:$0xff] }
 0x23c   : > { %v885_v3 = vpop.f32.mrf.mxu1  ;;  %1898 = vmatpush3.msra.mxu0 %v1791_v63 }
 0x23d   : > { %v900_v5 = vmax.f32 %v884_v2, 0.0  ;;  %1899 = vmatprep.subr.mxu0 %v2049_v37  ;;  %v1820_v2 = vld [vmem:[%s2497_s9 + $0xe0] sm:$0xff] }
 0x23e   : > { %v888_v6 = vpop.f32.mrf.mxu1  ;;  %1900 = vmatpush3.msra.mxu0 %v1790_v17 }
 0x23f   : > { %v905_v7 = vpack.c.bf16 %v900_v5, %v899_v4  ;;  %v889_v9 = vadd.f32 %v1761_v40, %v888_v6  ;;  %1901 = vmatprep.subr.mxu0 %v2049_v37 }
 0x240   : > { %v890_v8 = vpop.f32.mrf.mxu1  ;;  %1902 = vmatpush3.msra.mxu0 %v1789_v18 }
 0x241   : > { %1891 = vmatprep.mubr.msk.bf16.mxu0 %vm954_vm5, %v905_v7  ;;  %v901_v13 = vmax.f32 %v889_v9, 0.0  ;;  %1917 = vmatprep.subr.mxu0 %v2049_v37 }
 0x242   : > { %v891_v10 = vpop.f32.mrf.mxu1 }
 0x243   : > { %v892_v11 = vadd.f32 %v1761_v40, %v891_v10 }
 0x244   : > { %v893_v12 = vpop.f32.mrf.mxu1 }
 0x245   : > { %v902_v14 = vmax.f32 %v892_v11, 0.0 }
 0x247   : > { %v906_v15 = vpack.c.bf16 %v902_v14, %v901_v13 }
 0x249   : > { %1892 = vmatmul.mubr.msk.bf16.gmra.mxu0 %vm954_vm5, %v906_v15 }
 0x24a   : > { %1903 = vmatprep.mubr.msk.f32.mxu0 %vm2050_vm6, %v2049_v37 }
 0x2f9   : > { %v1889_v19 = vpop.f32.mrf.mxu0 }
 0x2fa   : > { %v1010_v0 = vadd.f32 %v1889_v19, %v2353_v20 }
 0x2fb   : > { %v1001_v21 = vpop.f32.mrf.mxu0 }
 0x2fc   : > { %v1002_v22 = vadd.f32 %v2353_v20, %v1001_v21  ;;  %v1034_v41 = vmax.f32 %v1010_v0, 0.0 }
 0x2fd   : > { %v1890_v23 = vpop.f32.mrf.mxu0 }
 0x2fe   : > { %v1032_v24 = vmax.f32 %v1002_v22, 0.0  ;;  %v1013_v29 = vadd.f32 %v1890_v23, %v2353_v20 }
 0x2ff   : > { %v1004_v26 = vpop.f32.mrf.mxu0 }
 0x300   : > { %v1005_v27 = vadd.f32 %v2353_v20, %v1004_v26  ;;  %1915 = vmatmul.mubr.msk.f32.vlgmr.msra.gmra.mxu1 %vm1049_vm7, %v1032_v24  ;;  %v1035_v35 = vmax.f32 %v1013_v29, 0.0  ;;  %v1825_v24 = vld [vmem:[%s2498_s10] ss:$0 sm:$0xff] }
 0x301   : > { %1929 = vmatpush3.msra.mxu1 %v1803_v25  ;;  %1936 = vmatprep.mubr.msk.f32.mxu1 %vm2050_vm6, %v2049_v37 }
 0x302   : > { %v1033_v30 = vmax.f32 %v1005_v27, 0.0  ;;  %1930 = vmatprep.subr.mxu1 %v2049_v37 }
 0x303   : > { %1931 = vmatpush3.msra.mxu1 %v1802_v28 }
 0x304   : > { %1932 = vmatprep.subr.mxu1 %v2049_v37  ;;  %1904 = vmatmul.mubr.msk.f32.vlgmr.msra.gmra.mxu0 %vm1049_vm7, %v1033_v30 }
 0x305   : > { %1918 = vmatpush3.msra.mxu0 %v1798_v31  ;;  %1933 = vmatpush3.msra.mxu1 %v1801_v32 }
 0x306   : > { %1919 = vmatprep.subr.mxu0 %v2049_v37  ;;  %1934 = vmatprep.subr.mxu1 %v2049_v37 }
 0x307   : > { %1920 = vmatpush3.msra.mxu0 %v1797_v33  ;;  %1935 = vmatpush3.msra.mxu1 %v1800_v34 }
 0x308   : > { %1921 = vmatprep.subr.mxu0 %v2049_v37  ;;  %1937 = vmatmul.mubr.msk.f32.vlgmr.msra.gmra.mxu1 %vm1049_vm7, %v1035_v35 }
 0x309   : > { %1922 = vmatpush3.msra.mxu0 %v1796_v36  ;;  %v1893_v40 = vpop.f32.mrf.mxu0  ;;  %1925 = vmatprep.mubr.msk.f32.mxu0 %vm2050_vm6, %v2049_v37 }
 0x30a   : > { %1923 = vmatprep.subr.mxu0 %v2049_v37  ;;  %1950 = vmatprep.subr.mxu1 %v2049_v37  ;;  %v1026_v61 = vadd.f32 %v1893_v40, %v2353_v20 }
 0x30b   : > { %1924 = vmatpush3.msra.mxu0 %v1795_v38  ;;  %v1017_v43 = vpop.f32.mrf.mxu0  ;;  %1951 = vmatpush3.msra.mxu1 %v1813_v39 }
 0x30c   : > { %1926 = vmatmul.mubr.msk.f32.vlgmr.msra.gmra.mxu0 %vm1049_vm7, %v1034_v41  ;;  %1939 = vmatprep.subr.mxu0 %v2049_v37  ;;  %v1018_v48 = vadd.f32 %v2353_v20, %v1017_v43  ;;  %v1038_v3 = vmax.f32 %v1026_v61, 0.0 }
 0x30d   : > { %1940 = vmatpush3.msra.mxu0 %v1808_v42  ;;  %v1894_v46 = vpop.f32.mrf.mxu0  ;;  %1952 = vmatprep.subr.mxu1 %v2049_v37 }
 0x30e   : > { %1941 = vmatprep.subr.mxu0 %v2049_v37  ;;  %1953 = vmatpush3.msra.mxu1 %v1812_v44  ;;  %v1036_v54 = vmax.f32 %v1018_v48, 0.0  ;;  %v1029_v63 = vadd.f32 %v1894_v46, %v2353_v20 }
 0x30f   : > { %1942 = vmatpush3.msra.mxu0 %v1807_v45  ;;  %v1020_v50 = vpop.f32.mrf.mxu0  ;;  %1954 = vmatprep.subr.mxu1 %v2049_v37 }
 0x310   : > { %v1021_v51 = vadd.f32 %v2353_v20, %v1020_v50  ;;  %1943 = vmatprep.subr.mxu0 %v2049_v37  ;;  %1955 = vmatpush3.msra.mxu1 %v1811_v47  ;;  %v1039_v4 = vmax.f32 %v1029_v63, 0.0 }
 0x311   : > { %1944 = vmatpush3.msra.mxu0 %v1806_v49  ;;  %1956 = vmatprep.subr.mxu1 %v2049_v37 }
 0x312   : > { %v1037_v55 = vmax.f32 %v1021_v51, 0.0  ;;  %1945 = vmatprep.subr.mxu0 %v2049_v37  ;;  %1947 = vmatprep.mubr.msk.f32.mxu0 %vm2050_vm6, %v2049_v37 }
 0x313   : > { %1946 = vmatpush3.msra.mxu0 %v1805_v52  ;;  %1957 = vmatpush3.msra.mxu1 %v1810_v53 }
 0x314   : > { %1948 = vmatmul.mubr.msk.f32.vlgmr.msra.gmra.mxu0 %vm1049_vm7, %v1036_v54  ;;  %1958 = vmatprep.mubr.msk.f32.mxu1 %vm2050_vm6, %v2049_v37 }
 0x315   : > { %1961 = vmatprep.subr.mxu0 %v2049_v37  ;;  %1972 = vmatprep.subr.mxu1 %v2049_v37 }
 0x316   : > { %1959 = vmatmul.mubr.msk.f32.vlgmr.msra.gmra.mxu1 %vm1049_vm7, %v1037_v55  ;;  %1962 = vmatpush3.msra.mxu0 %v1818_v56 }
 0x317   : > { %1973 = vmatpush3.msra.mxu1 %v1823_v57  ;;  %1963 = vmatprep.subr.mxu0 %v2049_v37 }
 0x318   : > { %1974 = vmatprep.subr.mxu1 %v2049_v37  ;;  %1964 = vmatpush3.msra.mxu0 %v1817_v58 }
 0x319   : > { %1975 = vmatpush3.msra.mxu1 %v1822_v59  ;;  %1965 = vmatprep.subr.mxu0 %v2049_v37 }
 0x31a   : > { %1976 = vmatprep.subr.mxu1 %v2049_v37  ;;  %1966 = vmatpush3.msra.mxu0 %v1816_v60 }
 0x31b   : > { %1977 = vmatpush3.msra.mxu1 %v1821_v62  ;;  %1967 = vmatprep.subr.mxu0 %v2049_v37 }
 0x31c   : > { %1978 = vmatprep.subr.mxu1 %v2049_v37  ;;  %1968 = vmatpush3.msra.mxu0 %v1815_v1 }
 0x31d   : > { %1969 = vmatprep.mubr.msk.f32.mxu0 %vm2050_vm6, %v2049_v37  ;;  %1979 = vmatpush3.msra.mxu1 %v1820_v2 }
 0x31e   : > { %1980 = vmatprep.mubr.msk.f32.mxu1 %vm2050_vm6, %v2049_v37  ;;  %1970 = vmatmul.mubr.msk.f32.vlgmr.msra.gmra.mxu0 %vm1049_vm7, %v1038_v3 }
 0x31f   : > { %1981 = vmatmul.mubr.msk.f32.vlgmr.msra.gmra.mxu1 %vm1049_vm7, %v1039_v4 }
 0x3c0   : > { %v1192_v5 = vpop.f32.mrf.mxu1 }
 0x3c2   : > { %v1916_v6 = vpop.f32.mrf.mxu1 }
 0x3c4   : > { %v1119_v7 = vpop.f32.mrf.mxu0 }
 0x3c5   : > { %v1193_v13 = vadd.f32 %v1192_v5, %v1119_v7 }
 0x3c6   : > { %v1905_v8 = vpop.f32.mrf.mxu0 }
 0x3c8   : > { %v1349_v9 = vpop.f32.mrf.mxu1 }
 0x3ca   : > { %v1938_v10 = vpop.f32.mrf.mxu1 }
 0x3cc   : > { %v1270_v11 = vpop.f32.mrf.mxu0 }
 0x3cd   : > { %v1274_v14 = vadd.f32 %v1270_v11, %v1193_v13 }
 0x3ce   : > { %v1927_v12 = vpop.f32.mrf.mxu0 }
 0x3cf   : > { %v1353_v37 = vadd.f32 %v1349_v9, %v1274_v14 }
 0x3d4   : > { %v1428_v15 = vpop.f32.mrf.mxu0 }
 0x3d5   : > { %v1432_v19 = vadd.f32 %v1428_v15, %v1353_v37 }
 0x3d6   : > { %v1507_v16 = vpop.f32.mrf.mxu1  ;;  %v1949_v17 = vpop.f32.mrf.mxu0 }
 0x3d7   : > { %v1511_v20 = vadd.f32 %v1507_v16, %v1432_v19 }
 0x3d8   : > { %v1960_v18 = vpop.f32.mrf.mxu1 }
 0x3de   : > { %v1586_v21 = vpop.f32.mrf.mxu0 }
 0x3df   : > { %v1590_v22 = vadd.f32 %v1586_v21, %v1511_v20  ;;  %v1665_v23 = vpop.f32.mrf.mxu1 }
 0x3e0   : > { %v1971_v25 = vpop.f32.mrf.mxu0 }
 0x3e1   : > { %v1669_v26 = vadd.f32 %v1665_v23, %v1590_v22  ;;  %v1982_v27 = vpop.f32.mrf.mxu1 }
 0x3e3   : > { %v1677_v28 = vadd.f32 %v1825_v24, %v1669_v26 }
 0x3e5   : > { %1679 = vst.msk [vmem:[%s386_s30] sm:$0xff] %vm1678_vm8, %v1677_v28 }
 0x3e6 PF: > { %s21_s17 = sadd.s32 1, %s2045_s17  }
 0x3e7   : > { %p18_p5 = scmp.ge.s32.totalorder %s21_s17, 4  }
 0x3e9   :  { %20 = sbr.rel (!%p18_p5) target bundleno = 1 (0x1), region = 101 }

</bundles_post_ra>
